<compile_context>
chip_gen: v7x
topology: tpu7x:2x2x1
jax: 0.10.0
libtpu: 0.0.40
codegen_flags: <defaults>
</compile_context>

<pallas_src>
import jax
import jax.numpy as jnp
from jax.experimental import pallas as pl
from jax.experimental.pallas import tpu as pltpu


def _round_up(x, m):
    return (x + m - 1) // m * m


def _tpu_budget_and_cores():
    """Best-effort (vmem_budget_bytes, num_tensorcores) for the local chip."""
    vmem_bytes = 64 << 20                       # conservative (v7x) fallback
    try:
        info = pltpu.get_tpu_info()
        vmem_bytes = int(getattr(info, "vmem_capacity_bytes", vmem_bytes)) or vmem_bytes
    except Exception:
        pass
    # 64 MiB-per-core generation (v7x) has 2 TensorCores/chip; 128 MiB parts
    # (v5e/v6e) are single-TC.
    num_tc = 2 if vmem_bytes <= (64 << 20) else 1
    # Leave headroom for compiler-internal scratch, the resident weight block
    # and semaphore/SMEM bookkeeping: ~48 MiB on v7x, ~96 MiB on v5e/v6e.
    budget = int(vmem_bytes * 3 // 4)
    return budget, num_tc


def _choose_batch_tile(b, block_b, num_tc):
    """Pick the batch tile (sublane dim): multiple of 8 or the full extent."""
    if b <= 8:
        return b
    full = _round_up(b, 8)
    tb = min(block_b, full)
    if num_tc >= 2:
        # >= 2*num_tc grid steps on megacore parts so each core double-buffers,
        # but never shrink the tile below 512 rows (keeps step overhead small).
        tb_split = _round_up(pl.cdiv(b, 2 * num_tc), 8)
        tb = min(tb, max(tb_split, min(512, full)))
    if tb >= b:
        return b                     # full-extent block: always legal, no tail padding
    return max(8, (tb // 8) * 8)


def _vmem_needed(tb, F, itemsize):
    # (3 inputs + 1 output) x double buffer x tile, plus resident weights + slack.
    return 4 * 2 * tb * F * itemsize + 3 * F * 4 + (2 << 20)


def _weighted_merge_kernel(bias_ref,                  # SMEM (3,)  [b_L, b_Sv, b_St]
                           l_ref, sv_ref, st_ref,     # VMEM (TB, F) each
                           w_ref,                     # VMEM (3, F) stacked fc weights
                           out_ref):                  # VMEM (TB, F)
    # Upcast to f32 for the alpha reductions / softmax (no-op for f32 inputs;
    # required on bf16 inputs and hidden under the HBM stream either way).
    L = l_ref[...].astype(jnp.float32)
    Sv = sv_ref[...].astype(jnp.float32)
    St = st_ref[...].astype(jnp.float32)
    W = w_ref[...].astype(jnp.float32)                # VMEM-resident across the grid

    # alpha_X = <X_row, w_X> + b_X for every row of the batch tile.
    # Exact f32 multiply + lane-reduce keeps 1e-5 parity with the reference
    # linear layers; the VPU/XLU work is fully hidden under the HBM stream
    # (this kernel is memory-bound: 3 reads + 1 write per element).
    a_L = jnp.sum(L * W[0:1, :], axis=-1, keepdims=True) + bias_ref[0]    # (TB, 1)
    a_Sv = jnp.sum(Sv * W[1:2, :], axis=-1, keepdims=True) + bias_ref[1]
    a_St = jnp.sum(St * W[2:3, :], axis=-1, keepdims=True) + bias_ref[2]

    # Numerically-stable 3-way softmax, vectorized over the TB rows.
    m = jnp.maximum(a_L, jnp.maximum(a_Sv, a_St))
    e_L = jnp.exp(a_L - m)
    e_Sv = jnp.exp(a_Sv - m)
    e_St = jnp.exp(a_St - m)
    # Exact divide keeps the 1e-5 parity check (pl.reciprocal(..., approx=True)
    # would shave the refinement at ~1e-3 relative error).
    inv = 1.0 / (e_L + e_Sv + e_St)

    # Weighted merge written as one lane-dense (TB, F) slab -> unmasked stores.
    out_ref[...] = ((e_L * inv) * L +
                    (e_Sv * inv) * Sv +
                    (e_St * inv) * St).astype(out_ref.dtype)


def weighted_merge(L, S_v, S_t, w_L, w_Sv, w_St, biases, *, block_b=4096):
    """L, S_v, S_t: (b, a, d); w_*: (a, d); biases: (3,) f32 [b_L, b_Sv, b_St]."""
    b, a, d = L.shape
    F = a * d                        # lane-dense feature width (full-extent last dim)

    # Flatten to lane-dense (b, F) slabs; stack the three weights into one array.
    Lf = L.reshape(b, F)
    Svf = S_v.reshape(b, F)
    Stf = S_t.reshape(b, F)
    W = jnp.stack([w_L.reshape(F).astype(jnp.float32),
                   w_Sv.reshape(F).astype(jnp.float32),
                   w_St.reshape(F).astype(jnp.float32)], axis=0)          # (3, F) f32
    biases = biases.astype(jnp.float32)

    vmem_budget, num_tc = _tpu_budget_and_cores()

    # Generation-aware batch tile (see module docstring).
    tb = _choose_batch_tile(b, block_b, num_tc)
    itemsize = jnp.dtype(L.dtype).itemsize
    # Shrink the tile if the double-buffered traffic would blow the VMEM budget.
    while tb > 8 and _vmem_needed(tb, F, itemsize) > vmem_budget:
        tb = max(8, (tb // 2 // 8) * 8)
    grid = (pl.cdiv(b, tb),)

    # Size the scoped-VMEM limit to the actual need (plus slack), capped at the
    # generation-aware budget (~48 MiB on v7x, ~96 MiB on v5e/v6e).
    vmem_needed = _vmem_needed(tb, F, itemsize)
    vmem_limit = int(min(max(vmem_needed, 32 << 20), vmem_budget))

    x_spec = pl.BlockSpec((tb, F), lambda i: (i, 0))
    w_spec = pl.BlockSpec((3, F), lambda i: (0, 0))   # constant -> stays VMEM-resident

    # TODO(synk): verify in a profile that the "parallel" batch axis actually
    # shards across both v7x TensorCores; if not, switch to CORE_PARALLEL or an
    # explicit core_map with a leading num_cores grid axis.
    out_flat = pl.pallas_call(
        _weighted_merge_kernel,
        out_shape=jax.ShapeDtypeStruct((b, F), L.dtype),
        grid_spec=pltpu.PrefetchScalarGridSpec(
            num_scalar_prefetch=0,
            grid=grid,
            in_specs=[
                pl.BlockSpec(memory_space=pltpu.SMEM),   # biases (3,)
                x_spec, x_spec, x_spec,                  # L, S_v, S_t (lane-dense)
                w_spec,                                  # stacked fc weights
            ],
            out_specs=x_spec,
        ),
        compiler_params=pltpu.CompilerParams(
            dimension_semantics=("parallel",),
            vmem_limit_bytes=vmem_limit,
        ),
    )(biases, Lf, Svf, Stf, W)

    return out_flat.reshape(b, a, d)


def weighted_merge_ref(L, S_v, S_t, w_L, w_Sv, w_St, biases):
    """Pure-JAX reference mirroring the PyTorch forward."""
    b = L.shape[0]
    a_L = jnp.sum(L.reshape(b, -1) * w_L.reshape(1, -1), axis=-1) + biases[0]
    a_Sv = jnp.sum(S_v.reshape(b, -1) * w_Sv.reshape(1, -1), axis=-1) + biases[1]
    a_St = jnp.sum(S_t.reshape(b, -1) * w_St.reshape(1, -1), axis=-1) + biases[2]
    alphas = jnp.stack([a_L, a_Sv, a_St], axis=1)
    weights = jax.nn.softmax(alphas, axis=1)
    wL = weights[:, 0][:, None, None]
    wSv = weights[:, 1][:, None, None]
    wSt = weights[:, 2][:, None, None]
    return wL * L + wSv * S_v + wSt * S_t


if __name__ == "__main__":
    # Small shapes consistent with the module: a=8, d=32 (a*d = 256 lanes).
    b, a, d = 16, 8, 32
    key = jax.random.PRNGKey(0)
    k1, k2, k3, k4, k5, k6, k7 = jax.random.split(key, 7)

    L = jax.random.normal(k1, (b, a, d), dtype=jnp.float32)
    S_v = jax.random.normal(k2, (b, a, d), dtype=jnp.float32)
    S_t = jax.random.normal(k3, (b, a, d), dtype=jnp.float32)

    # Deterministic parameter init (shapes match nn.Linear(a*d, 1)).
    scale = 1.0 / jnp.sqrt(a * d)
    w_L = (jax.random.uniform(k4, (a, d), dtype=jnp.float32) * 2 - 1) * scale
    w_Sv = (jax.random.uniform(k5, (a, d), dtype=jnp.float32) * 2 - 1) * scale
    w_St = (jax.random.uniform(k6, (a, d), dtype=jnp.float32) * 2 - 1) * scale
    biases = (jax.random.uniform(k7, (3,), dtype=jnp.float32) * 2 - 1) * scale

    # Main check: full-extent single-step path.
    out = weighted_merge(L, S_v, S_t, w_L, w_Sv, w_St, biases)
    out = jax.block_until_ready(out)
    ref = weighted_merge_ref(L, S_v, S_t, w_L, w_Sv, w_St, biases)
    assert out.shape == (b, a, d)
    assert jnp.allclose(out, ref, atol=1e-5, rtol=1e-5), float(jnp.max(jnp.abs(out - ref)))

    # Tail-block check: batch not a multiple of the tile (b=13, forced tb=8 ->
    # 2 grid steps, second step is a padded/masked tail). Padded rows flow
    # through exp()/divide but never reach the output thanks to the masked
    # writeback; this asserts that stays correct.
    b2 = 13
    L2, Sv2, St2 = L[:b2], S_v[:b2], S_t[:b2]
    out2 = weighted_merge(L2, Sv2, St2, w_L, w_Sv, w_St, biases, block_b=8)
    out2 = jax.block_until_ready(out2)
    ref2 = weighted_merge_ref(L2, Sv2, St2, w_L, w_Sv, w_St, biases)
    assert out2.shape == (b2, a, d)
    assert jnp.allclose(out2, ref2, atol=1e-5, rtol=1e-5), float(jnp.max(jnp.abs(out2 - ref2)))

    print("KERNEL_OK")
</pallas_src>

<mosaic_0001>
module attributes {stable_mosaic.version = 11 : i64} {
  func.func @_weighted_merge_kernel(%arg0: i32, %arg1: memref<3xf32, #tpu.memory_space<smem>>, %arg2: memref<16x256xf32, #tpu.memory_space<vmem>>, %arg3: memref<16x256xf32, #tpu.memory_space<vmem>>, %arg4: memref<16x256xf32, #tpu.memory_space<vmem>>, %arg5: memref<3x256xf32, #tpu.memory_space<vmem>>, %arg6: memref<16x256xf32, #tpu.memory_space<vmem>>) attributes {dimension_semantics = [#tpu.dimension_semantics<parallel>], iteration_bounds = array<i64: 1>, scalar_prefetch = 0 : i64, scratch_operands = 0 : i64, tpu.core_type = #tpu.core_type<tc>, window_params = [{transform_indices = @transform_0, window_bounds = array<i64: 3>}, {transform_indices = @transform_1, window_bounds = array<i64: 16, 256>}, {transform_indices = @transform_2, window_bounds = array<i64: 16, 256>}, {transform_indices = @transform_3, window_bounds = array<i64: 16, 256>}, {pipeline_mode = #tpu.pipeline_mode<synchronous>, transform_indices = @transform_4, window_bounds = array<i64: 3, 256>}, {transform_indices = @transform_5, window_bounds = array<i64: 16, 256>}]} {
    %c0 = arith.constant 0 : index
    %c0_0 = arith.constant 0 : index
    %0 = vector.load %arg2[%c0, %c0_0] : memref<16x256xf32, #tpu.memory_space<vmem>>, vector<16x256xf32>
    %c0_1 = arith.constant 0 : index
    %c0_2 = arith.constant 0 : index
    %1 = vector.load %arg3[%c0_1, %c0_2] : memref<16x256xf32, #tpu.memory_space<vmem>>, vector<16x256xf32>
    %c0_3 = arith.constant 0 : index
    %c0_4 = arith.constant 0 : index
    %2 = vector.load %arg4[%c0_3, %c0_4] : memref<16x256xf32, #tpu.memory_space<vmem>>, vector<16x256xf32>
    %c0_5 = arith.constant 0 : index
    %c0_6 = arith.constant 0 : index
    %3 = vector.load %arg5[%c0_5, %c0_6] : memref<3x256xf32, #tpu.memory_space<vmem>>, vector<3x256xf32>
    %4 = vector.extract_strided_slice %3 {offsets = [0, 0], sizes = [1, 256], strides = [1, 1]} : vector<3x256xf32> to vector<1x256xf32>
    %5 = vector.broadcast %4 : vector<1x256xf32> to vector<16x256xf32>
    %6 = arith.mulf %0, %5 : vector<16x256xf32>
    %cst = arith.constant dense<0.000000e+00> : vector<16xf32>
    %7 = vector.multi_reduction <add>, %6, %cst [1] : vector<16x256xf32> to vector<16xf32>
    %8 = vector.shape_cast %7 : vector<16xf32> to vector<16x1xf32>
    %c0_7 = arith.constant 0 : index
    %9 = memref.load %arg1[%c0_7] : memref<3xf32, #tpu.memory_space<smem>>
    %10 = vector.broadcast %9 : f32 to vector<16x1xf32>
    %11 = arith.addf %8, %10 : vector<16x1xf32>
    %12 = vector.extract_strided_slice %3 {offsets = [1, 0], sizes = [1, 256], strides = [1, 1]} : vector<3x256xf32> to vector<1x256xf32>
    %13 = vector.broadcast %12 : vector<1x256xf32> to vector<16x256xf32>
    %14 = arith.mulf %1, %13 : vector<16x256xf32>
    %cst_8 = arith.constant dense<0.000000e+00> : vector<16xf32>
    %15 = vector.multi_reduction <add>, %14, %cst_8 [1] : vector<16x256xf32> to vector<16xf32>
    %16 = vector.shape_cast %15 : vector<16xf32> to vector<16x1xf32>
    %c1 = arith.constant 1 : index
    %17 = memref.load %arg1[%c1] : memref<3xf32, #tpu.memory_space<smem>>
    %18 = vector.broadcast %17 : f32 to vector<16x1xf32>
    %19 = arith.addf %16, %18 : vector<16x1xf32>
    %20 = vector.extract_strided_slice %3 {offsets = [2, 0], sizes = [1, 256], strides = [1, 1]} : vector<3x256xf32> to vector<1x256xf32>
    %21 = vector.broadcast %20 : vector<1x256xf32> to vector<16x256xf32>
    %22 = arith.mulf %2, %21 : vector<16x256xf32>
    %cst_9 = arith.constant dense<0.000000e+00> : vector<16xf32>
    %23 = vector.multi_reduction <add>, %22, %cst_9 [1] : vector<16x256xf32> to vector<16xf32>
    %24 = vector.shape_cast %23 : vector<16xf32> to vector<16x1xf32>
    %c2 = arith.constant 2 : index
    %25 = memref.load %arg1[%c2] : memref<3xf32, #tpu.memory_space<smem>>
    %26 = vector.broadcast %25 : f32 to vector<16x1xf32>
    %27 = arith.addf %24, %26 : vector<16x1xf32>
    %28 = arith.maximumf %19, %27 : vector<16x1xf32>
    %29 = arith.maximumf %11, %28 : vector<16x1xf32>
    %30 = arith.subf %11, %29 : vector<16x1xf32>
    %31 = math.exp %30 : vector<16x1xf32>
    %32 = arith.subf %19, %29 : vector<16x1xf32>
    %33 = math.exp %32 : vector<16x1xf32>
    %34 = arith.subf %27, %29 : vector<16x1xf32>
    %35 = math.exp %34 : vector<16x1xf32>
    %36 = arith.addf %31, %33 : vector<16x1xf32>
    %37 = arith.addf %36, %35 : vector<16x1xf32>
    %cst_10 = arith.constant 1.000000e+00 : f32
    %38 = vector.broadcast %cst_10 : f32 to vector<16x1xf32>
    %39 = arith.divf %38, %37 : vector<16x1xf32>
    %40 = arith.mulf %31, %39 : vector<16x1xf32>
    %41 = vector.broadcast %40 : vector<16x1xf32> to vector<16x256xf32>
    %42 = arith.mulf %41, %0 : vector<16x256xf32>
    %43 = arith.mulf %33, %39 : vector<16x1xf32>
    %44 = vector.broadcast %43 : vector<16x1xf32> to vector<16x256xf32>
    %45 = arith.mulf %44, %1 : vector<16x256xf32>
    %46 = arith.addf %42, %45 : vector<16x256xf32>
    %47 = arith.mulf %35, %39 : vector<16x1xf32>
    %48 = vector.broadcast %47 : vector<16x1xf32> to vector<16x256xf32>
    %49 = arith.mulf %48, %2 : vector<16x256xf32>
    %50 = arith.addf %46, %49 : vector<16x256xf32>
    %c0_11 = arith.constant 0 : index
    %c0_12 = arith.constant 0 : index
    %51 = vector.load %arg6[%c0_11, %c0_12] : memref<16x256xf32, #tpu.memory_space<vmem>>, vector<16x256xf32>
    tpu.vector_store %arg6[%c0_11, %c0_12], %50 {strides = array<i32>} : memref<16x256xf32, #tpu.memory_space<vmem>>, vector<16x256xf32>,
    return
  }
  func.func @transform_0(%arg0: i32) -> i32 {
    %c0_i32 = arith.constant 0 : i32
    %c0_i32_0 = arith.constant 0 : i32
    return %c0_i32 : i32
  }
  func.func @transform_1(%arg0: i32) -> (i32, i32) {
    %c0_i32 = arith.constant 0 : i32
    %c0_i32_0 = arith.constant 0 : i32
    return %arg0, %c0_i32 : i32, i32
  }
  func.func @transform_2(%arg0: i32) -> (i32, i32) {
    %c0_i32 = arith.constant 0 : i32
    %c0_i32_0 = arith.constant 0 : i32
    return %arg0, %c0_i32 : i32, i32
  }
  func.func @transform_3(%arg0: i32) -> (i32, i32) {
    %c0_i32 = arith.constant 0 : i32
    %c0_i32_0 = arith.constant 0 : i32
    return %arg0, %c0_i32 : i32, i32
  }
  func.func @transform_4(%arg0: i32) -> (i32, i32) {
    %c0_i32 = arith.constant 0 : i32
    %c0_i32_0 = arith.constant 0 : i32
    %c0_i32_1 = arith.constant 0 : i32
    return %c0_i32, %c0_i32_0 : i32, i32
  }
  func.func @transform_5(%arg0: i32) -> (i32, i32) {
    %c0_i32 = arith.constant 0 : i32
    %c0_i32_0 = arith.constant 0 : i32
    return %arg0, %c0_i32 : i32, i32
  }
}

</mosaic_0001>

<bundles_post_ra>
// kernel: tpu_custom_call.1
= control target key start
LH: loop header
LB: loop body
LE: loop exit
PB: predicated region body
PF: predicated region fallthrough
CT: control target
= control target key end

     0   :  { %10 = vsyncpa [#allocation5], 0  ;;  %s553_s0 = inlined_call_operand.hbm [shape: f32[3], index: 0, kind: input, shape index: {}]   ;;  %s554_s1 = inlined_call_operand.hbm [shape: f32[16,256], index: 1, kind: input, shape index: {}]   ;;  %s555_s2 = inlined_call_operand.hbm [shape: f32[16,256], index: 2, kind: input, shape index: {}]   ;;  %s556_s3 = inlined_call_operand.hbm [shape: f32[16,256], index: 3, kind: input, shape index: {}]   ;;  %s557_s4 = inlined_call_operand.vmem [shape: f32[3,256], index: 4, kind: input, shape index: {}]   ;;  %s558_s5 = inlined_call_operand.hbm [shape: f32[16,256], index: 5, kind: output, shape index: {}]  }
   0x1   :  { %11 = vsyncpa [#allocation3], 0 }
   0x2   :  { %12 = vsyncpa [#allocation8], 0 }
   0x3   :  { %13 = vsyncpa [#allocation4], 0  ;;  %s393_s18 = smov [#allocation7]   ;;  %s394_s20 = smov [#allocation6]  }
   0x4   :  { %s39_s19 = sshll.u32 %s393_s18, 4  ;;  %s27_s21 = sshll.u32 %s394_s20, 4  ;;  %s40_s19 = int_to_ptr.vmem [resolvable:$true] %s39_s19  ;;  %s28_s21 = int_to_ptr.vmem [resolvable:$true] %s27_s21 }
   0x5   :  { %s287_s24 = scalar_lea.hbm %s555_s2, 512 }
   0x6   :  { %p288_p0 = scmp.ne.s32.totalorder %s555_s2, %s287_s24  ;;  %p291_p1 = scmp.lt.u32.totalorder %s287_s24, %s555_s2 }
   0x8   :  { %p293_p2 = pnand %p291_p1, %p288_p0 }
   0xa   :  { %296 = shalt.err (!%p293_p2)
}
   0xb   :  { %s297_s29 = scalar_lea.vmem %s40_s19, 512  ;;  %p302_p4 = scmp.lt.s32.totalorder %s40_s19, %s40_s19 }
   0xc   :  { %p298_p3 = scmp.ne.s32.totalorder %s40_s19, %s297_s29  ;;  %p303_p5 = scmp.lt.s32.totalorder %s297_s29, %s297_s29 }
   0xe   :  { %p304_p6 = por %p303_p5, %p302_p4 }
  0x10   :  { %p305_p7 = pnand %p304_p6, %p298_p3 }
  0x12   :  { %308 = shalt.err (!%p305_p7)
}
  0x13   :  { %s395_s30 = smov 256   ;;  %s396_s6 = smov 16  }
  0x14   :  { %45 = dma.hbm_to_vmem [thread:$0]  %s555_s2, 512, %s40_s19, [#allocation8], %s395_s30, %s395_s30, %s396_s6  }
  0x15   :  { %s309_s11 = scalar_lea.hbm %s553_s0, 16 }
  0x16   :  { %p310_p8 = scmp.ne.s32.totalorder %s553_s0, %s309_s11  ;;  %p313_p9 = scmp.lt.u32.totalorder %s309_s11, %s553_s0 }
  0x18   :  { %p315_p10 = pnand %p313_p9, %p310_p8 }
  0x1a   :  { %318 = shalt.err (!%p315_p10)
}
  0x1b   :  { %s397_s16 = smov [#allocation2]   ;;  %s319_s20 = scalar_lea.hbm %s554_s1, 512 }
  0x1c   :  { %21 = dma.hbm_to_smem %s553_s0, 16, %s397_s16, [#allocation5]  }
  0x1d   :  { %p320_p11 = scmp.ne.s32.totalorder %s554_s1, %s319_s20  ;;  %p323_p12 = scmp.lt.u32.totalorder %s319_s20, %s554_s1 }
  0x1f   :  { %p325_p13 = pnand %p323_p12, %p320_p11 }
  0x21   :  { %328 = shalt.err (!%p325_p13)
}
  0x22   :  { %s329_s26 = scalar_lea.vmem %s28_s21, 512  ;;  %p334_p1 = scmp.lt.s32.totalorder %s28_s21, %s28_s21 }
  0x23   :  { %p330_p0 = scmp.ne.s32.totalorder %s28_s21, %s329_s26  ;;  %p335_p2 = scmp.lt.s32.totalorder %s329_s26, %s329_s26 }
  0x25   :  { %p336_p3 = por %p335_p2, %p334_p1 }
  0x27   :  { %p337_p4 = pnand %p336_p3, %p330_p0 }
  0x29   :  { %340 = shalt.err (!%p337_p4)
}
  0x2a   :  { %33 = dma.hbm_to_vmem [thread:$0]  %s554_s1, 512, %s28_s21, [#allocation3], %s395_s30, %s395_s30, %s396_s6  }
  0x2b   :  { %s398_s28 = smov [#allocation9]   ;;  %s341_s9 = scalar_lea.hbm %s556_s3, 512 }
  0x2c   :  { %s51_s29 = sshll.u32 %s398_s28, 4  ;;  %p342_p5 = scmp.ne.s32.totalorder %s556_s3, %s341_s9  ;;  %s52_s29 = int_to_ptr.vmem [resolvable:$true] %s51_s29 }
  0x2d   :  { %p345_p6 = scmp.lt.u32.totalorder %s341_s9, %s556_s3 }
  0x2f   :  { %p347_p7 = pnand %p345_p6, %p342_p5 }
  0x31   :  { %350 = shalt.err (!%p347_p7)
}
  0x32   :  { %s351_s14 = scalar_lea.vmem %s52_s29, 512  ;;  %p356_p9 = scmp.lt.s32.totalorder %s52_s29, %s52_s29 }
  0x33   :  { %p352_p8 = scmp.ne.s32.totalorder %s52_s29, %s351_s14  ;;  %p357_p10 = scmp.lt.s32.totalorder %s351_s14, %s351_s14 }
  0x35   :  { %p358_p11 = por %p357_p10, %p356_p9 }
  0x37   :  { %p359_p12 = pnand %p358_p11, %p352_p8 }
  0x39   :  { %362 = shalt.err (!%p359_p12)
}
  0x3a   :  { %57 = dma.hbm_to_vmem [thread:$0]  %s556_s3, 512, %s52_s29, [#allocation8], %s395_s30, %s395_s30, %s396_s6  }
  0x3b   :  { %385 = dma.done.wait [#allocation5], 16  }
  0x3c   :  { %386 = vsyncadd [#allocation5], 4294967280 }
  0x3d   :  { %387 = dma.done.wait [#allocation3], 512  }
  0x3e   :  { %388 = vsyncadd [#allocation3], 4294966784 }
  0x3f   :  { %389 = dma.done.wait [#allocation8], 1024  }
  0x40   :  { %390 = vsyncadd [#allocation8], 4294966272 }
  0x41   :  { %72 = sfence }
  0x42   :  { %v87_v0 = vlaneseq  ;;  %v85_v2 = vld [vmem:[%s557_s4] sm:$0x77]  ;;  %v490_v9 = vld [vmem:[#allocation9] sm:$0xff]  ;;  %v492_v10 = vld [vmem:[#allocation9 + $0x8] sm:$0xff]  ;;  %s263_s3 = sld [smem:[#allocation2 + $0x2]]  ;;  %s262_s4 = sld [smem:[#allocation2 + $0x1]] }
  0x43   :  { %v494_v15 = vld [vmem:[#allocation7] sm:$0xff]  ;;  %v496_v16 = vld [vmem:[#allocation7 + $0x8] sm:$0xff]  ;;  %v498_v17 = vld [vmem:[#allocation9 + $0x10] sm:$0xff]  ;;  %s115_s17 = sld [smem:[#allocation2]]  ;;  %s399_s18 = smov [#allocation10]  }
  0x44   :  { %v88_v1 = vshrl.u32 %v87_v0, 7  ;;  %v500_v24 = vld [vmem:[#allocation9 + $0x18] sm:$0xff]  ;;  %v502_v25 = vld [vmem:[#allocation7 + $0x10] sm:$0xff]  ;;  %v518_v39 = vld [vmem:[#allocation6] sm:$0xff]  ;;  %s248_s2 = sshll.u32 %s399_s18, 4  ;;  %s249_s2 = int_to_ptr.vmem [resolvable:$true] %s248_s2 }
  0x45   :  { %v504_v26 = vld [vmem:[#allocation7 + $0x18] sm:$0xff]  ;;  %v510_v33 = vld [vmem:[#allocation6 + $0x10] sm:$0xff]  ;;  %v520_v40 = vld [vmem:[#allocation6 + $0x8] sm:$0xff]  ;;  %s363_s19 = scalar_lea.vmem %s249_s2, 512  ;;  %p368_p0 = scmp.lt.s32.totalorder %s249_s2, %s249_s2 }
  0x46   :  { %v153_v3 = vsub.s32 2, %v88_v1  ;;  %v157_v4 = vsub.s32 6, %v88_v1  ;;  %v121_v5 = vsub.s32 1, %v88_v1  ;;  %v125_v6 = vsub.s32 5, %v88_v1  ;;  %v512_v34 = vld [vmem:[#allocation6 + $0x18] sm:$0xff]  ;;  %p364_p13 = scmp.ne.s32.totalorder %s249_s2, %s363_s19  ;;  %p369_p1 = scmp.lt.s32.totalorder %s363_s19, %s363_s19 }
  0x47   :  { %v89_v7 = vsub.s32 0, %v88_v1  ;;  %v93_v8 = vsub.s32 4, %v88_v1 }
  0x48   :  { %v154_v11 = vrot.slane %v85_v2, %v153_v3  ;;  %v158_v12 = vrot.slane %v85_v2, %v157_v4  ;;  %v122_v13 = vrot.slane %v85_v2, %v121_v5  ;;  %v126_v14 = vrot.slane %v85_v2, %v125_v6  ;;  %p370_p2 = por %p369_p1, %p368_p0 }
  0x49   :  { %v90_v18 = vrot.slane %v85_v2, %v89_v7  ;;  %v94_v19 = vrot.slane %v85_v2, %v93_v8  ;;  %v180_v53 = vstv %s263_s3  ;;  %v148_v54 = vstv %s262_s4 }
  0x4a   :  { %v164_v20 = vrot.slane %v154_v11, %v153_v3  ;;  %v168_v21 = vrot.slane %v158_v12, %v153_v3  ;;  %v132_v22 = vrot.slane %v122_v13, %v121_v5  ;;  %v136_v23 = vrot.slane %v126_v14, %v121_v5  ;;  %p371_p3 = pnand %p370_p2, %p364_p13 }
  0x4b   :  { %v100_v27 = vrot.slane %v90_v18, %v89_v7  ;;  %v104_v28 = vrot.slane %v94_v19, %v89_v7  ;;  %v116_v61 = vstv %s115_s17 }
  0x4c   :  { %v169_v29 = vmul.f32 %v164_v20, %v490_v9  ;;  %v170_v30 = vmul.f32 %v168_v21, %v492_v10  ;;  %v137_v31 = vmul.f32 %v132_v22, %v494_v15  ;;  %v138_v32 = vmul.f32 %v136_v23, %v496_v16 }
  0x4d   :  { %v171_v35 = vmul.f32 %v164_v20, %v498_v17  ;;  %v172_v36 = vmul.f32 %v168_v21, %v500_v24  ;;  %v139_v37 = vmul.f32 %v132_v22, %v502_v25  ;;  %v140_v38 = vmul.f32 %v136_v23, %v504_v26 }
  0x4e   :  { %v173_v41 = vadd.f32 %v170_v30, %v169_v29  ;;  %v141_v42 = vadd.f32 %v138_v32, %v137_v31  ;;  %v107_v44 = vmul.f32 %v100_v27, %v510_v33  ;;  %v108_v45 = vmul.f32 %v104_v28, %v512_v34 }
  0x4f   :  { %v176_v43 = vadd.f32 %v172_v36, %v171_v35  ;;  %v144_v46 = vadd.f32 %v140_v38, %v139_v37  ;;  %v105_v47 = vmul.f32 %v100_v27, %v518_v39  ;;  %v106_v48 = vmul.f32 %v104_v28, %v520_v40 }
  0x50   :  { %174 = vadd.xlane.f32.xlu1 %v173_v41  ;;  %142 = vadd.xlane.f32.xlu0 %v141_v42  ;;  %v112_v49 = vadd.f32 %v108_v45, %v107_v44 }
  0x51   :  { %v109_v50 = vadd.f32 %v106_v48, %v105_v47 }
  0x54   :  { %177 = vadd.xlane.f32.xlu1 %v176_v43  ;;  %145 = vadd.xlane.f32.xlu0 %v144_v46 }
  0x58   :  { %113 = vadd.xlane.f32.xlu1 %v112_v49  ;;  %110 = vadd.xlane.f32.xlu0 %v109_v50 }
  0xdd   :  { %v175_v51 = vpop.xlane.xlu1 %174  ;;  %v143_v52 = vpop.xlane.xlu0 %142 }
  0xde   :  { %v181_v57 = vadd.f32 %v180_v53, %v175_v51  ;;  %v149_v58 = vadd.f32 %v148_v54, %v143_v52 }
  0xe0   :  { %v183_v0 = vmax.f32 %v149_v58, %v181_v57 }
  0xe1   :  { %v178_v55 = vpop.xlane.xlu1 %177  ;;  %v146_v56 = vpop.xlane.xlu0 %145 }
  0xe2   :  { %v182_v59 = vadd.f32 %v180_v53, %v178_v55  ;;  %v150_v60 = vadd.f32 %v148_v54, %v146_v56 }
  0xe4   :  { %v184_v1 = vmax.f32 %v150_v60, %v182_v59 }
  0xe5   :  { %v114_v62 = vpop.xlane.xlu1 %113  ;;  %v111_v63 = vpop.xlane.xlu0 %110 }
  0xe6   :  { %v118_v2 = vadd.f32 %v116_v61, %v114_v62  ;;  %v117_v3 = vadd.f32 %v116_v61, %v111_v63 }
  0xe8   :  { %v186_v4 = vmax.f32 %v118_v2, %v184_v1  ;;  %v185_v5 = vmax.f32 %v117_v3, %v183_v0 }
  0xea   :  { %v188_v6 = vsub.f32 %v118_v2, %v186_v4  ;;  %v194_v7 = vsub.f32 %v150_v60, %v186_v4  ;;  %v200_v8 = vsub.f32 %v182_v59, %v186_v4  ;;  %v187_v11 = vsub.f32 %v117_v3, %v185_v5 }
  0xeb   :  { %v193_v12 = vsub.f32 %v149_v58, %v185_v5  ;;  %v199_v19 = vsub.f32 %v181_v57, %v185_v5 }
  0xec   :  { %v191_v13 = vmul.f32 1.442695, %v188_v6  ;;  %v197_v14 = vmul.f32 1.442695, %v194_v7  ;;  %v203_v18 = vmul.f32 1.442695, %v200_v8 }
  0xed   :  { %v189_v20 = vmul.f32 1.442695, %v187_v11  ;;  %v195_v21 = vmul.f32 1.442695, %v193_v12  ;;  %v201_v22 = vmul.f32 1.442695, %v199_v19 }
  0xee   :  { %271 = vpow2.f32 %v191_v13 }
  0xef   :  { %273 = vpow2.f32 %v197_v14 }
  0xf0   :  { %275 = vpow2.f32 %v203_v18 }
  0xf1   :  { %277 = vpow2.f32 %v189_v20 }
  0xf2   :  { %279 = vpow2.f32 %v195_v21 }
  0xf3   :  { %281 = vpow2.f32 %v201_v22 }
  0xf8   :  { %v272_v23 = vpop.eup %271 }
  0xf9   :  { %v274_v27 = vpop.eup %273 }
  0xfa   :  { %v276_v28 = vpop.eup %275  ;;  %v206_v29 = vadd.f32 %v274_v27, %v272_v23 }
  0xfb   :  { %v278_v30 = vpop.eup %277 }
  0xfc   :  { %v280_v31 = vpop.eup %279  ;;  %v208_v32 = vadd.f32 %v276_v28, %v206_v29 }
  0xfd   :  { %v205_v35 = vadd.f32 %v280_v31, %v278_v30  ;;  %v282_v36 = vpop.eup %281 }
  0xfe   :  { %283 = vrcp.f32 %v208_v32 }
  0xff   :  { %v207_v37 = vadd.f32 %v282_v36, %v205_v35 }
 0x101   :  { %285 = vrcp.f32 %v207_v37 }
 0x108   :  { %v284_v38 = vpop.eup %283 }
 0x109   :  { %v214_v41 = vmul.f32 %v284_v38, %v272_v23  ;;  %v220_v42 = vmul.f32 %v284_v38, %v274_v27  ;;  %v230_v43 = vmul.f32 %v284_v38, %v276_v28 }
 0x10b   :  { %v286_v44 = vpop.eup %285  ;;  %v217_v45 = vmul.f32 %v214_v41, %v510_v33  ;;  %v218_v46 = vmul.f32 %v214_v41, %v512_v34  ;;  %v223_v47 = vmul.f32 %v220_v42, %v502_v25  ;;  %v224_v48 = vmul.f32 %v220_v42, %v504_v26 }
 0x10c   :  { %v213_v49 = vmul.f32 %v286_v44, %v278_v30  ;;  %v219_v50 = vmul.f32 %v286_v44, %v280_v31  ;;  %v229_v51 = vmul.f32 %v286_v44, %v282_v36  ;;  %v233_v54 = vmul.f32 %v230_v43, %v498_v17 }
 0x10d   :  { %v227_v52 = vadd.f32 %v223_v47, %v217_v45  ;;  %v228_v53 = vadd.f32 %v224_v48, %v218_v46  ;;  %v234_v55 = vmul.f32 %v230_v43, %v500_v24 }
 0x10e   :  { %v215_v56 = vmul.f32 %v213_v49, %v518_v39  ;;  %v216_v57 = vmul.f32 %v213_v49, %v520_v40  ;;  %v221_v33 = vmul.f32 %v219_v50, %v494_v15  ;;  %v222_v34 = vmul.f32 %v219_v50, %v496_v16 }
 0x10f   :  { %v237_v25 = vadd.f32 %v233_v54, %v227_v52  ;;  %v238_v58 = vadd.f32 %v234_v55, %v228_v53  ;;  %v231_v60 = vmul.f32 %v229_v51, %v490_v9  ;;  %v232_v17 = vmul.f32 %v229_v51, %v492_v10 }
 0x110   :  { %v225_v26 = vadd.f32 %v221_v33, %v215_v56  ;;  %v226_v59 = vadd.f32 %v222_v34, %v216_v57 }
 0x111   :  { %241 = vst [vmem:[#allocation10 + $0x10] sm:$0xff] %v237_v25  ;;  %242 = vst [vmem:[#allocation10 + $0x18] sm:$0xff] %v238_v58 }
 0x112   :  { %v235_v24 = vadd.f32 %v231_v60, %v225_v26  ;;  %v236_v39 = vadd.f32 %v232_v17, %v226_v59 }
 0x114   :  { %239 = vst [vmem:[#allocation10] sm:$0xff] %v235_v24  ;;  %240 = vst [vmem:[#allocation10 + $0x8] sm:$0xff] %v236_v39 }
 0x115   :  { %374 = shalt.err (!%p371_p3)
}
 0x116   :  { %s375_s23 = scalar_lea.hbm %s558_s5, 512 }
 0x117   :  { %p376_p4 = scmp.ne.s32.totalorder %s558_s5, %s375_s23  ;;  %p379_p5 = scmp.lt.u32.totalorder %s375_s23, %s558_s5 }
 0x119   :  { %p381_p6 = pnand %p379_p5, %p376_p4 }
 0x11b   :  { %384 = shalt.err (!%p381_p6)
}
 0x11c   :  { %254 = dma.vmem_to_hbm [thread:$0]  %s249_s2, 512, %s558_s5, [#allocation4], %s395_s30, %s395_s30, %s396_s6  }
 0x11d   :  { %391 = dma.done.wait [#allocation4], 512  }
 0x11e   :  { %392 = vsyncadd [#allocation4], 4294966784 }
 0x11f   :  { %258 = vsyncpa [#allocation3], 1 }
 0x120   :  { %259 = vsyncpa [#allocation8], 1 }
 0x121   :  { %260 = vsyncpa [#allocation4], 1 }
 0x122   :  { %261 = vsyncpa [#allocation5], 1 }

</bundles_post_ra>
